<compile_context>
chip_gen: v7x
topology: tpu7x:2x2x1
jax: 0.10.0
libtpu: 0.0.40
codegen_flags: <defaults>
</compile_context>

<pallas_src>
import functools

import jax
import jax.numpy as jnp
from jax.experimental import pallas as pl
from jax.experimental.pallas import tpu as pltpu


def _mmlstm_kernel(x_ref, wih_ref, bias_ref, whh_ref, wout_ref, bout_ref,
                   y_ref, h_out_ref, c_out_ref, h_hist, *, T, B, H):
    """One grid step = one full modality: T-step LSTM recurrence + output head.

    x_ref   : (1, T*B, D)  time folded into rows (wrapper-side reshape)
    wih_ref : (1, D, 4H)   per-modality input weights, pre-transposed, gate
                           columns permuted to [i, f, o, g]
    bias_ref: (1, 1, 4H)   fused b_ih[m] + b_hh (same permutation)
    whh_ref : (H, 4H)      shared hidden weights (same permutation)
    wout_ref: (H, H), bout_ref: (1, H)
    y_ref   : (1, T*B, H)  softmax outputs, time folded
    h_hist  : VMEM (T*B, H) scratch holding the h_t history for the deferred head
    """
    # Hoisted input projection: does not depend on h, so it leaves the serial
    # chain. One (T*B, D) @ (D, 4H) matmul + one fused bias add per modality.
    gates_in = (jnp.dot(x_ref[0], wih_ref[0], preferred_element_type=jnp.float32)
                + bias_ref[0])                                        # (T*B, 4H)

    whh = whh_ref[...]                                                # (H, 4H)
    h = jnp.zeros((B, H), jnp.float32)
    c = jnp.zeros((B, H), jnp.float32)

    # Sequential recurrence. T is a small static trip count -> fully unrolled
    # with static offsets; only h @ W_hh + activations are on the critical path.
    for t in range(T):
        gates = gates_in[t * B:(t + 1) * B, :] + jnp.dot(
            h, whh, preferred_element_type=jnp.float32)               # (B, 4H)
        # gate order (permuted wrapper-side): [i, f, o | g]
        s = jax.nn.sigmoid(gates[:, :3 * H])                          # (B, 3H)
        g = jnp.tanh(gates[:, 3 * H:])                                # (B, H)
        c = s[:, H:2 * H] * c + s[:, :H] * g
        h = s[:, 2 * H:3 * H] * jnp.tanh(c)
        h_hist[t * B:(t + 1) * B, :] = h

    # Deferred output head: one matmul + one softmax over all T*B rows.
    logits = (jnp.dot(h_hist[...], wout_ref[...],
                      preferred_element_type=jnp.float32) + bout_ref[...])
    logits = logits - jnp.max(logits, axis=-1, keepdims=True)
    e = jnp.exp(logits)
    inv = pl.reciprocal(jnp.sum(e, axis=-1, keepdims=True), approx=True)
    y_ref[0] = e * inv

    h_out_ref[0, 0] = h
    c_out_ref[0, 0] = c


def mmlstm_forward(x, params):
    """x: [M, T, B, D] float32; params are torch-style Linear weights.

    Returns (y[M,T,B,H], h[M,1,B,H], c[M,1,B,H])  (n_layers = 1).
    """
    w_ih, b_ih, w_hh, b_hh, w_out, b_out = params
    M, T, B, D = x.shape
    H = w_hh.shape[1]
    G = 4 * H

    # ---- wrapper-side layout plumbing (no extra kernel work) --------------
    # Permute gate columns from torch chunk order [i, f, g, o] to [i, f, o, g]
    # so the kernel applies one sigmoid over [0:3H] and one tanh over [3H:4H].
    perm = jnp.concatenate([jnp.arange(0, H), jnp.arange(H, 2 * H),
                            jnp.arange(3 * H, 4 * H), jnp.arange(2 * H, 3 * H)])
    wih_t = jnp.transpose(w_ih[:, perm, :], (0, 2, 1))       # (M, D, 4H)
    whh_t = jnp.transpose(w_hh[perm, :])                     # (H, 4H)
    bias = (b_ih + b_hh[None, :])[:, perm].reshape(M, 1, G)  # fused b_ih + b_hh
    wout_t = jnp.transpose(w_out)                            # (H, H)
    bout = b_out.reshape(1, H)

    # Fold time into rows: one DMA in / one DMA out per modality.
    x2d = x.reshape(M, T * B, D)

    out_shapes = (
        jax.ShapeDtypeStruct((M, T * B, H), jnp.float32),    # y (time folded)
        jax.ShapeDtypeStruct((M, 1, B, H), jnp.float32),     # h (n_layers=1)
        jax.ShapeDtypeStruct((M, 1, B, H), jnp.float32),     # c (n_layers=1)
    )

    grid_spec = pltpu.PrefetchScalarGridSpec(
        num_scalar_prefetch=0,
        grid=(M,),
        in_specs=[
            pl.BlockSpec((1, T * B, D), lambda m: (m, 0, 0)),    # x
            pl.BlockSpec((1, D, G),     lambda m: (m, 0, 0)),    # w_ih^T (per modality)
            pl.BlockSpec((1, 1, G),     lambda m: (m, 0, 0)),    # fused bias (per modality)
            pl.BlockSpec((H, G),        lambda m: (0, 0)),       # w_hh^T (shared)
            pl.BlockSpec((H, H),        lambda m: (0, 0)),       # w_out^T
            pl.BlockSpec((1, H),        lambda m: (0, 0)),       # b_out
        ],
        out_specs=[
            pl.BlockSpec((1, T * B, H), lambda m: (m, 0, 0)),    # y
            pl.BlockSpec((1, 1, B, H),  lambda m: (m, 0, 0, 0)), # h final
            pl.BlockSpec((1, 1, B, H),  lambda m: (m, 0, 0, 0)), # c final
        ],
        scratch_shapes=[
            pltpu.VMEM((T * B, H), jnp.float32),   # h_t history for deferred head
        ],
    )

    # Advisory cost estimate so XLA schedules surrounding ops sensibly.
    flops = 2 * M * T * B * G * (D + H) + 2 * M * T * B * H * H
    transcendentals = M * T * B * 6 * H          # sigmoid(3H) + 2*tanh(H) + exp(H)
    bytes_accessed = 4 * (M * T * B * D + M * T * B * H + 2 * M * B * H
                          + M * D * G + M * G + H * G + H * H + H)
    cost = pl.CostEstimate(flops=flops, transcendentals=transcendentals,
                           bytes_accessed=bytes_accessed)

    y2d, h_out, c_out = pl.pallas_call(
        functools.partial(_mmlstm_kernel, T=T, B=B, H=H),
        out_shape=out_shapes,
        grid_spec=grid_spec,
        compiler_params=pltpu.CompilerParams(
            # Modalities are fully independent (state is kernel-local), so the
            # grid axis is parallel -> v7x megacore shards it across 2 TCs.
            dimension_semantics=("parallel",)),
        cost_estimate=cost,
    )(x2d, wih_t, bias, whh_t, wout_t, bout)

    return y2d.reshape(M, T, B, H), h_out, c_out


def init_params(key, n_modalities, input_size, hidden_size):
    """Torch-Linear-style init (U(-1/sqrt(fan_in), 1/sqrt(fan_in))), torch layout."""
    H, D, M, G = hidden_size, input_size, n_modalities, 4 * hidden_size
    ks = jax.random.split(key, 6)

    def u(k, shape, fan_in):
        b = 1.0 / jnp.sqrt(float(fan_in))
        return jax.random.uniform(k, shape, jnp.float32, -b, b)

    w_ih = u(ks[0], (M, G, D), D)     # per-modality Linear(D, 4H).weight
    b_ih = u(ks[1], (M, G), D)
    w_hh = u(ks[2], (G, H), H)        # shared Linear(H, 4H).weight
    b_hh = u(ks[3], (G,), H)
    w_out = u(ks[4], (H, H), H)       # linear_out
    b_out = u(ks[5], (H,), H)
    return (w_ih, b_ih, w_hh, b_hh, w_out, b_out)


def mmlstm_ref(x, params):
    """Pure-JAX reference reproducing the PyTorch forward (n_layers=1)."""
    w_ih, b_ih, w_hh, b_hh, w_out, b_out = params
    M, T, B, D = x.shape
    H = w_hh.shape[1]
    ys, hs, cs = [], [], []
    for m in range(M):
        h = jnp.zeros((B, H), jnp.float32)
        c = jnp.zeros((B, H), jnp.float32)
        ym = []
        for t in range(T):
            gates = x[m, t] @ w_ih[m].T + b_ih[m] + h @ w_hh.T + b_hh
            i = jax.nn.sigmoid(gates[:, 0:H])
            f = jax.nn.sigmoid(gates[:, H:2 * H])
            g = jnp.tanh(gates[:, 2 * H:3 * H])
            o = jax.nn.sigmoid(gates[:, 3 * H:4 * H])
            c = f * c + i * g
            h = o * jnp.tanh(c)
            ym.append(jax.nn.softmax(h @ w_out.T + b_out, axis=-1))
        ys.append(jnp.stack(ym, 0))
        hs.append(h)
        cs.append(c)
    return (jnp.stack(ys, 0),
            jnp.stack(hs, 0)[:, None],
            jnp.stack(cs, 0)[:, None])


if __name__ == "__main__":
    M, T, B, D, H = 3, 8, 8, 16, 32   # modalities, time, batch, input_size, hidden_size
    key = jax.random.PRNGKey(0)
    kx, kp = jax.random.split(key)

    x = jax.random.normal(kx, (M, T, B, D), jnp.float32)
    params = init_params(kp, M, D, H)

    y, h_out, c_out = jax.block_until_ready(mmlstm_forward(x, params))

    y_ref, h_ref, c_ref = mmlstm_ref(x, params)
    assert y.shape == (M, T, B, H)
    assert h_out.shape == (M, 1, B, H) and c_out.shape == (M, 1, B, H)
    # y uses the approx EUP reciprocal in the softmax -> slightly looser tol.
    assert jnp.allclose(y, y_ref, atol=1e-3, rtol=1e-3)
    assert jnp.allclose(h_out, h_ref, atol=1e-5, rtol=1e-5)
    assert jnp.allclose(c_out, c_ref, atol=1e-5, rtol=1e-5)

    print("KERNEL_OK")
</pallas_src>

<mosaic_0001>
module attributes {stable_mosaic.version = 11 : i64} {
  func.func @_mmlstm_kernel(%arg0: i32, %arg1: memref<1x64x16xf32, #tpu.memory_space<vmem>>, %arg2: memref<1x16x128xf32, #tpu.memory_space<vmem>>, %arg3: memref<1x1x128xf32, #tpu.memory_space<vmem>>, %arg4: memref<32x128xf32, #tpu.memory_space<vmem>>, %arg5: memref<32x32xf32, #tpu.memory_space<vmem>>, %arg6: memref<1x32xf32, #tpu.memory_space<vmem>>, %arg7: memref<1x64x32xf32, #tpu.memory_space<vmem>>, %arg8: memref<1x1x8x32xf32, #tpu.memory_space<vmem>>, %arg9: memref<1x1x8x32xf32, #tpu.memory_space<vmem>>, %arg10: memref<64x32xf32, #tpu.memory_space<vmem>>) attributes {dimension_semantics = [#tpu.dimension_semantics<parallel>], iteration_bounds = array<i64: 3>, scalar_prefetch = 0 : i64, scratch_operands = 1 : i64, tpu.core_type = #tpu.core_type<tc>, window_params = [{transform_indices = @transform_0, window_bounds = array<i64: 1, 64, 16>}, {transform_indices = @transform_1, window_bounds = array<i64: 1, 16, 128>}, {transform_indices = @transform_2, window_bounds = array<i64: 1, 1, 128>}, {pipeline_mode = #tpu.pipeline_mode<synchronous>, transform_indices = @transform_3, window_bounds = array<i64: 32, 128>}, {pipeline_mode = #tpu.pipeline_mode<synchronous>, transform_indices = @transform_4, window_bounds = array<i64: 32, 32>}, {pipeline_mode = #tpu.pipeline_mode<synchronous>, transform_indices = @transform_5, window_bounds = array<i64: 1, 32>}, {transform_indices = @transform_6, window_bounds = array<i64: 1, 64, 32>}, {transform_indices = @transform_7, window_bounds = array<i64: 1, 1, 8, 32>}, {transform_indices = @transform_8, window_bounds = array<i64: 1, 1, 8, 32>}]} {
    %c0 = arith.constant 0 : index
    %c0_0 = arith.constant 0 : index
    %c0_1 = arith.constant 0 : index
    %0 = vector.load %arg1[%c0, %c0_0, %c0_1] : memref<1x64x16xf32, #tpu.memory_space<vmem>>, vector<1x64x16xf32>
    %1 = vector.shape_cast %0 : vector<1x64x16xf32> to vector<64x16xf32>
    %c0_2 = arith.constant 0 : index
    %c0_3 = arith.constant 0 : index
    %c0_4 = arith.constant 0 : index
    %2 = vector.load %arg2[%c0_2, %c0_3, %c0_4] : memref<1x16x128xf32, #tpu.memory_space<vmem>>, vector<1x16x128xf32>
    %3 = vector.shape_cast %2 : vector<1x16x128xf32> to vector<16x128xf32>
    %cst = arith.constant dense<0.000000e+00> : vector<64x128xf32>
    %4 = tpu.matmul %1, %3, %cst {dimension_numbers = #tpu.dot_dimension_numbers<[1], [0], [0], [1], [0, 0, 1, 1], [], []>} : vector<64x16xf32>, vector<16x128xf32>, vector<64x128xf32> -> vector<64x128xf32>
    %c0_5 = arith.constant 0 : index
    %c0_6 = arith.constant 0 : index
    %c0_7 = arith.constant 0 : index
    %5 = vector.load %arg3[%c0_5, %c0_6, %c0_7] : memref<1x1x128xf32, #tpu.memory_space<vmem>>, vector<1x1x128xf32>
    %6 = vector.shape_cast %5 : vector<1x1x128xf32> to vector<1x128xf32>
    %7 = vector.broadcast %6 : vector<1x128xf32> to vector<64x128xf32>
    %8 = arith.addf %4, %7 : vector<64x128xf32>
    %c0_8 = arith.constant 0 : index
    %c0_9 = arith.constant 0 : index
    %9 = vector.load %arg4[%c0_8, %c0_9] : memref<32x128xf32, #tpu.memory_space<vmem>>, vector<32x128xf32>
    %cst_10 = arith.constant 0.000000e+00 : f32
    %10 = vector.broadcast %cst_10 : f32 to vector<8x32xf32>
    %cst_11 = arith.constant 0.000000e+00 : f32
    %11 = vector.broadcast %cst_11 : f32 to vector<8x32xf32>
    %12 = vector.extract_strided_slice %8 {offsets = [0, 0], sizes = [8, 128], strides = [1, 1]} : vector<64x128xf32> to vector<8x128xf32>
    %cst_12 = arith.constant dense<0.000000e+00> : vector<8x128xf32>
    %13 = tpu.matmul %10, %9, %cst_12 {dimension_numbers = #tpu.dot_dimension_numbers<[1], [0], [0], [1], [0, 0, 1, 1], [], []>} : vector<8x32xf32>, vector<32x128xf32>, vector<8x128xf32> -> vector<8x128xf32>
    %14 = arith.addf %12, %13 : vector<8x128xf32>
    %15 = vector.extract_strided_slice %14 {offsets = [0, 0], sizes = [8, 96], strides = [1, 1]} : vector<8x128xf32> to vector<8x96xf32>
    %16 = arith.negf %15 : vector<8x96xf32>
    %17 = math.exp %16 : vector<8x96xf32>
    %cst_13 = arith.constant 1.000000e+00 : f32
    %18 = vector.broadcast %cst_13 : f32 to vector<8x96xf32>
    %19 = arith.addf %18, %17 : vector<8x96xf32>
    %20 = arith.divf %18, %19 : vector<8x96xf32>
    %21 = vector.extract_strided_slice %14 {offsets = [0, 96], sizes = [8, 32], strides = [1, 1]} : vector<8x128xf32> to vector<8x32xf32>
    %22 = math.tanh %21 : vector<8x32xf32>
    %23 = vector.extract_strided_slice %20 {offsets = [0, 32], sizes = [8, 32], strides = [1, 1]} : vector<8x96xf32> to vector<8x32xf32>
    %24 = arith.mulf %23, %11 : vector<8x32xf32>
    %25 = vector.extract_strided_slice %20 {offsets = [0, 0], sizes = [8, 32], strides = [1, 1]} : vector<8x96xf32> to vector<8x32xf32>
    %26 = arith.mulf %25, %22 : vector<8x32xf32>
    %27 = arith.addf %24, %26 : vector<8x32xf32>
    %28 = vector.extract_strided_slice %20 {offsets = [0, 64], sizes = [8, 32], strides = [1, 1]} : vector<8x96xf32> to vector<8x32xf32>
    %29 = math.tanh %27 : vector<8x32xf32>
    %30 = arith.mulf %28, %29 : vector<8x32xf32>
    %c0_14 = arith.constant 0 : index
    %c0_15 = arith.constant 0 : index
    %31 = vector.load %arg10[%c0_14, %c0_15] : memref<64x32xf32, #tpu.memory_space<vmem>>, vector<8x32xf32>
    tpu.vector_store %arg10[%c0_14, %c0_15], %30 {strides = array<i32>} : memref<64x32xf32, #tpu.memory_space<vmem>>, vector<8x32xf32>,
    %32 = vector.extract_strided_slice %8 {offsets = [8, 0], sizes = [8, 128], strides = [1, 1]} : vector<64x128xf32> to vector<8x128xf32>
    %cst_16 = arith.constant dense<0.000000e+00> : vector<8x128xf32>
    %33 = tpu.matmul %30, %9, %cst_16 {dimension_numbers = #tpu.dot_dimension_numbers<[1], [0], [0], [1], [0, 0, 1, 1], [], []>} : vector<8x32xf32>, vector<32x128xf32>, vector<8x128xf32> -> vector<8x128xf32>
    %34 = arith.addf %32, %33 : vector<8x128xf32>
    %35 = vector.extract_strided_slice %34 {offsets = [0, 0], sizes = [8, 96], strides = [1, 1]} : vector<8x128xf32> to vector<8x96xf32>
    %36 = arith.negf %35 : vector<8x96xf32>
    %37 = math.exp %36 : vector<8x96xf32>
    %cst_17 = arith.constant 1.000000e+00 : f32
    %38 = vector.broadcast %cst_17 : f32 to vector<8x96xf32>
    %39 = arith.addf %38, %37 : vector<8x96xf32>
    %40 = arith.divf %38, %39 : vector<8x96xf32>
    %41 = vector.extract_strided_slice %34 {offsets = [0, 96], sizes = [8, 32], strides = [1, 1]} : vector<8x128xf32> to vector<8x32xf32>
    %42 = math.tanh %41 : vector<8x32xf32>
    %43 = vector.extract_strided_slice %40 {offsets = [0, 32], sizes = [8, 32], strides = [1, 1]} : vector<8x96xf32> to vector<8x32xf32>
    %44 = arith.mulf %43, %27 : vector<8x32xf32>
    %45 = vector.extract_strided_slice %40 {offsets = [0, 0], sizes = [8, 32], strides = [1, 1]} : vector<8x96xf32> to vector<8x32xf32>
    %46 = arith.mulf %45, %42 : vector<8x32xf32>
    %47 = arith.addf %44, %46 : vector<8x32xf32>
    %48 = vector.extract_strided_slice %40 {offsets = [0, 64], sizes = [8, 32], strides = [1, 1]} : vector<8x96xf32> to vector<8x32xf32>
    %49 = math.tanh %47 : vector<8x32xf32>
    %50 = arith.mulf %48, %49 : vector<8x32xf32>
    %c8 = arith.constant 8 : index
    %c0_18 = arith.constant 0 : index
    %51 = vector.load %arg10[%c8, %c0_18] : memref<64x32xf32, #tpu.memory_space<vmem>>, vector<8x32xf32>
    tpu.vector_store %arg10[%c8, %c0_18], %50 {strides = array<i32>} : memref<64x32xf32, #tpu.memory_space<vmem>>, vector<8x32xf32>,
    %52 = vector.extract_strided_slice %8 {offsets = [16, 0], sizes = [8, 128], strides = [1, 1]} : vector<64x128xf32> to vector<8x128xf32>
    %cst_19 = arith.constant dense<0.000000e+00> : vector<8x128xf32>
    %53 = tpu.matmul %50, %9, %cst_19 {dimension_numbers = #tpu.dot_dimension_numbers<[1], [0], [0], [1], [0, 0, 1, 1], [], []>} : vector<8x32xf32>, vector<32x128xf32>, vector<8x128xf32> -> vector<8x128xf32>
    %54 = arith.addf %52, %53 : vector<8x128xf32>
    %55 = vector.extract_strided_slice %54 {offsets = [0, 0], sizes = [8, 96], strides = [1, 1]} : vector<8x128xf32> to vector<8x96xf32>
    %56 = arith.negf %55 : vector<8x96xf32>
    %57 = math.exp %56 : vector<8x96xf32>
    %cst_20 = arith.constant 1.000000e+00 : f32
    %58 = vector.broadcast %cst_20 : f32 to vector<8x96xf32>
    %59 = arith.addf %58, %57 : vector<8x96xf32>
    %60 = arith.divf %58, %59 : vector<8x96xf32>
    %61 = vector.extract_strided_slice %54 {offsets = [0, 96], sizes = [8, 32], strides = [1, 1]} : vector<8x128xf32> to vector<8x32xf32>
    %62 = math.tanh %61 : vector<8x32xf32>
    %63 = vector.extract_strided_slice %60 {offsets = [0, 32], sizes = [8, 32], strides = [1, 1]} : vector<8x96xf32> to vector<8x32xf32>
    %64 = arith.mulf %63, %47 : vector<8x32xf32>
    %65 = vector.extract_strided_slice %60 {offsets = [0, 0], sizes = [8, 32], strides = [1, 1]} : vector<8x96xf32> to vector<8x32xf32>
    %66 = arith.mulf %65, %62 : vector<8x32xf32>
    %67 = arith.addf %64, %66 : vector<8x32xf32>
    %68 = vector.extract_strided_slice %60 {offsets = [0, 64], sizes = [8, 32], strides = [1, 1]} : vector<8x96xf32> to vector<8x32xf32>
    %69 = math.tanh %67 : vector<8x32xf32>
    %70 = arith.mulf %68, %69 : vector<8x32xf32>
    %c16 = arith.constant 16 : index
    %c0_21 = arith.constant 0 : index
    %71 = vector.load %arg10[%c16, %c0_21] : memref<64x32xf32, #tpu.memory_space<vmem>>, vector<8x32xf32>
    tpu.vector_store %arg10[%c16, %c0_21], %70 {strides = array<i32>} : memref<64x32xf32, #tpu.memory_space<vmem>>, vector<8x32xf32>,
    %72 = vector.extract_strided_slice %8 {offsets = [24, 0], sizes = [8, 128], strides = [1, 1]} : vector<64x128xf32> to vector<8x128xf32>
    %cst_22 = arith.constant dense<0.000000e+00> : vector<8x128xf32>
    %73 = tpu.matmul %70, %9, %cst_22 {dimension_numbers = #tpu.dot_dimension_numbers<[1], [0], [0], [1], [0, 0, 1, 1], [], []>} : vector<8x32xf32>, vector<32x128xf32>, vector<8x128xf32> -> vector<8x128xf32>
    %74 = arith.addf %72, %73 : vector<8x128xf32>
    %75 = vector.extract_strided_slice %74 {offsets = [0, 0], sizes = [8, 96], strides = [1, 1]} : vector<8x128xf32> to vector<8x96xf32>
    %76 = arith.negf %75 : vector<8x96xf32>
    %77 = math.exp %76 : vector<8x96xf32>
    %cst_23 = arith.constant 1.000000e+00 : f32
    %78 = vector.broadcast %cst_23 : f32 to vector<8x96xf32>
    %79 = arith.addf %78, %77 : vector<8x96xf32>
    %80 = arith.divf %78, %79 : vector<8x96xf32>
    %81 = vector.extract_strided_slice %74 {offsets = [0, 96], sizes = [8, 32], strides = [1, 1]} : vector<8x128xf32> to vector<8x32xf32>
    %82 = math.tanh %81 : vector<8x32xf32>
    %83 = vector.extract_strided_slice %80 {offsets = [0, 32], sizes = [8, 32], strides = [1, 1]} : vector<8x96xf32> to vector<8x32xf32>
    %84 = arith.mulf %83, %67 : vector<8x32xf32>
    %85 = vector.extract_strided_slice %80 {offsets = [0, 0], sizes = [8, 32], strides = [1, 1]} : vector<8x96xf32> to vector<8x32xf32>
    %86 = arith.mulf %85, %82 : vector<8x32xf32>
    %87 = arith.addf %84, %86 : vector<8x32xf32>
    %88 = vector.extract_strided_slice %80 {offsets = [0, 64], sizes = [8, 32], strides = [1, 1]} : vector<8x96xf32> to vector<8x32xf32>
    %89 = math.tanh %87 : vector<8x32xf32>
    %90 = arith.mulf %88, %89 : vector<8x32xf32>
    %c24 = arith.constant 24 : index
    %c0_24 = arith.constant 0 : index
    %91 = vector.load %arg10[%c24, %c0_24] : memref<64x32xf32, #tpu.memory_space<vmem>>, vector<8x32xf32>
    tpu.vector_store %arg10[%c24, %c0_24], %90 {strides = array<i32>} : memref<64x32xf32, #tpu.memory_space<vmem>>, vector<8x32xf32>,
    %92 = vector.extract_strided_slice %8 {offsets = [32, 0], sizes = [8, 128], strides = [1, 1]} : vector<64x128xf32> to vector<8x128xf32>
    %cst_25 = arith.constant dense<0.000000e+00> : vector<8x128xf32>
    %93 = tpu.matmul %90, %9, %cst_25 {dimension_numbers = #tpu.dot_dimension_numbers<[1], [0], [0], [1], [0, 0, 1, 1], [], []>} : vector<8x32xf32>, vector<32x128xf32>, vector<8x128xf32> -> vector<8x128xf32>
    %94 = arith.addf %92, %93 : vector<8x128xf32>
    %95 = vector.extract_strided_slice %94 {offsets = [0, 0], sizes = [8, 96], strides = [1, 1]} : vector<8x128xf32> to vector<8x96xf32>
    %96 = arith.negf %95 : vector<8x96xf32>
    %97 = math.exp %96 : vector<8x96xf32>
    %cst_26 = arith.constant 1.000000e+00 : f32
    %98 = vector.broadcast %cst_26 : f32 to vector<8x96xf32>
    %99 = arith.addf %98, %97 : vector<8x96xf32>
    %100 = arith.divf %98, %99 : vector<8x96xf32>
    %101 = vector.extract_strided_slice %94 {offsets = [0, 96], sizes = [8, 32], strides = [1, 1]} : vector<8x128xf32> to vector<8x32xf32>
    %102 = math.tanh %101 : vector<8x32xf32>
    %103 = vector.extract_strided_slice %100 {offsets = [0, 32], sizes = [8, 32], strides = [1, 1]} : vector<8x96xf32> to vector<8x32xf32>
    %104 = arith.mulf %103, %87 : vector<8x32xf32>
    %105 = vector.extract_strided_slice %100 {offsets = [0, 0], sizes = [8, 32], strides = [1, 1]} : vector<8x96xf32> to vector<8x32xf32>
    %106 = arith.mulf %105, %102 : vector<8x32xf32>
    %107 = arith.addf %104, %106 : vector<8x32xf32>
    %108 = vector.extract_strided_slice %100 {offsets = [0, 64], sizes = [8, 32], strides = [1, 1]} : vector<8x96xf32> to vector<8x32xf32>
    %109 = math.tanh %107 : vector<8x32xf32>
    %110 = arith.mulf %108, %109 : vector<8x32xf32>
    %c32 = arith.constant 32 : index
    %c0_27 = arith.constant 0 : index
    %111 = vector.load %arg10[%c32, %c0_27] : memref<64x32xf32, #tpu.memory_space<vmem>>, vector<8x32xf32>
    tpu.vector_store %arg10[%c32, %c0_27], %110 {strides = array<i32>} : memref<64x32xf32, #tpu.memory_space<vmem>>, vector<8x32xf32>,
    %112 = vector.extract_strided_slice %8 {offsets = [40, 0], sizes = [8, 128], strides = [1, 1]} : vector<64x128xf32> to vector<8x128xf32>
    %cst_28 = arith.constant dense<0.000000e+00> : vector<8x128xf32>
    %113 = tpu.matmul %110, %9, %cst_28 {dimension_numbers = #tpu.dot_dimension_numbers<[1], [0], [0], [1], [0, 0, 1, 1], [], []>} : vector<8x32xf32>, vector<32x128xf32>, vector<8x128xf32> -> vector<8x128xf32>
    %114 = arith.addf %112, %113 : vector<8x128xf32>
    %115 = vector.extract_strided_slice %114 {offsets = [0, 0], sizes = [8, 96], strides = [1, 1]} : vector<8x128xf32> to vector<8x96xf32>
    %116 = arith.negf %115 : vector<8x96xf32>
    %117 = math.exp %116 : vector<8x96xf32>
    %cst_29 = arith.constant 1.000000e+00 : f32
    %118 = vector.broadcast %cst_29 : f32 to vector<8x96xf32>
    %119 = arith.addf %118, %117 : vector<8x96xf32>
    %120 = arith.divf %118, %119 : vector<8x96xf32>
    %121 = vector.extract_strided_slice %114 {offsets = [0, 96], sizes = [8, 32], strides = [1, 1]} : vector<8x128xf32> to vector<8x32xf32>
    %122 = math.tanh %121 : vector<8x32xf32>
    %123 = vector.extract_strided_slice %120 {offsets = [0, 32], sizes = [8, 32], strides = [1, 1]} : vector<8x96xf32> to vector<8x32xf32>
    %124 = arith.mulf %123, %107 : vector<8x32xf32>
    %125 = vector.extract_strided_slice %120 {offsets = [0, 0], sizes = [8, 32], strides = [1, 1]} : vector<8x96xf32> to vector<8x32xf32>
    %126 = arith.mulf %125, %122 : vector<8x32xf32>
    %127 = arith.addf %124, %126 : vector<8x32xf32>
    %128 = vector.extract_strided_slice %120 {offsets = [0, 64], sizes = [8, 32], strides = [1, 1]} : vector<8x96xf32> to vector<8x32xf32>
    %129 = math.tanh %127 : vector<8x32xf32>
    %130 = arith.mulf %128, %129 : vector<8x32xf32>
    %c40 = arith.constant 40 : index
    %c0_30 = arith.constant 0 : index
    %131 = vector.load %arg10[%c40, %c0_30] : memref<64x32xf32, #tpu.memory_space<vmem>>, vector<8x32xf32>
    tpu.vector_store %arg10[%c40, %c0_30], %130 {strides = array<i32>} : memref<64x32xf32, #tpu.memory_space<vmem>>, vector<8x32xf32>,
    %132 = vector.extract_strided_slice %8 {offsets = [48, 0], sizes = [8, 128], strides = [1, 1]} : vector<64x128xf32> to vector<8x128xf32>
    %cst_31 = arith.constant dense<0.000000e+00> : vector<8x128xf32>
    %133 = tpu.matmul %130, %9, %cst_31 {dimension_numbers = #tpu.dot_dimension_numbers<[1], [0], [0], [1], [0, 0, 1, 1], [], []>} : vector<8x32xf32>, vector<32x128xf32>, vector<8x128xf32> -> vector<8x128xf32>
    %134 = arith.addf %132, %133 : vector<8x128xf32>
    %135 = vector.extract_strided_slice %134 {offsets = [0, 0], sizes = [8, 96], strides = [1, 1]} : vector<8x128xf32> to vector<8x96xf32>
    %136 = arith.negf %135 : vector<8x96xf32>
    %137 = math.exp %136 : vector<8x96xf32>
    %cst_32 = arith.constant 1.000000e+00 : f32
    %138 = vector.broadcast %cst_32 : f32 to vector<8x96xf32>
    %139 = arith.addf %138, %137 : vector<8x96xf32>
    %140 = arith.divf %138, %139 : vector<8x96xf32>
    %141 = vector.extract_strided_slice %134 {offsets = [0, 96], sizes = [8, 32], strides = [1, 1]} : vector<8x128xf32> to vector<8x32xf32>
    %142 = math.tanh %141 : vector<8x32xf32>
    %143 = vector.extract_strided_slice %140 {offsets = [0, 32], sizes = [8, 32], strides = [1, 1]} : vector<8x96xf32> to vector<8x32xf32>
    %144 = arith.mulf %143, %127 : vector<8x32xf32>
    %145 = vector.extract_strided_slice %140 {offsets = [0, 0], sizes = [8, 32], strides = [1, 1]} : vector<8x96xf32> to vector<8x32xf32>
    %146 = arith.mulf %145, %142 : vector<8x32xf32>
    %147 = arith.addf %144, %146 : vector<8x32xf32>
    %148 = vector.extract_strided_slice %140 {offsets = [0, 64], sizes = [8, 32], strides = [1, 1]} : vector<8x96xf32> to vector<8x32xf32>
    %149 = math.tanh %147 : vector<8x32xf32>
    %150 = arith.mulf %148, %149 : vector<8x32xf32>
    %c48 = arith.constant 48 : index
    %c0_33 = arith.constant 0 : index
    %151 = vector.load %arg10[%c48, %c0_33] : memref<64x32xf32, #tpu.memory_space<vmem>>, vector<8x32xf32>
    tpu.vector_store %arg10[%c48, %c0_33], %150 {strides = array<i32>} : memref<64x32xf32, #tpu.memory_space<vmem>>, vector<8x32xf32>,
    %152 = vector.extract_strided_slice %8 {offsets = [56, 0], sizes = [8, 128], strides = [1, 1]} : vector<64x128xf32> to vector<8x128xf32>
    %cst_34 = arith.constant dense<0.000000e+00> : vector<8x128xf32>
    %153 = tpu.matmul %150, %9, %cst_34 {dimension_numbers = #tpu.dot_dimension_numbers<[1], [0], [0], [1], [0, 0, 1, 1], [], []>} : vector<8x32xf32>, vector<32x128xf32>, vector<8x128xf32> -> vector<8x128xf32>
    %154 = arith.addf %152, %153 : vector<8x128xf32>
    %155 = vector.extract_strided_slice %154 {offsets = [0, 0], sizes = [8, 96], strides = [1, 1]} : vector<8x128xf32> to vector<8x96xf32>
    %156 = arith.negf %155 : vector<8x96xf32>
    %157 = math.exp %156 : vector<8x96xf32>
    %cst_35 = arith.constant 1.000000e+00 : f32
    %158 = vector.broadcast %cst_35 : f32 to vector<8x96xf32>
    %159 = arith.addf %158, %157 : vector<8x96xf32>
    %160 = arith.divf %158, %159 : vector<8x96xf32>
    %161 = vector.extract_strided_slice %154 {offsets = [0, 96], sizes = [8, 32], strides = [1, 1]} : vector<8x128xf32> to vector<8x32xf32>
    %162 = math.tanh %161 : vector<8x32xf32>
    %163 = vector.extract_strided_slice %160 {offsets = [0, 32], sizes = [8, 32], strides = [1, 1]} : vector<8x96xf32> to vector<8x32xf32>
    %164 = arith.mulf %163, %147 : vector<8x32xf32>
    %165 = vector.extract_strided_slice %160 {offsets = [0, 0], sizes = [8, 32], strides = [1, 1]} : vector<8x96xf32> to vector<8x32xf32>
    %166 = arith.mulf %165, %162 : vector<8x32xf32>
    %167 = arith.addf %164, %166 : vector<8x32xf32>
    %168 = vector.extract_strided_slice %160 {offsets = [0, 64], sizes = [8, 32], strides = [1, 1]} : vector<8x96xf32> to vector<8x32xf32>
    %169 = math.tanh %167 : vector<8x32xf32>
    %170 = arith.mulf %168, %169 : vector<8x32xf32>
    %c56 = arith.constant 56 : index
    %c0_36 = arith.constant 0 : index
    %171 = vector.load %arg10[%c56, %c0_36] : memref<64x32xf32, #tpu.memory_space<vmem>>, vector<8x32xf32>
    tpu.vector_store %arg10[%c56, %c0_36], %170 {strides = array<i32>} : memref<64x32xf32, #tpu.memory_space<vmem>>, vector<8x32xf32>,
    %c0_37 = arith.constant 0 : index
    %c0_38 = arith.constant 0 : index
    %172 = vector.load %arg10[%c0_37, %c0_38] : memref<64x32xf32, #tpu.memory_space<vmem>>, vector<64x32xf32>
    %c0_39 = arith.constant 0 : index
    %c0_40 = arith.constant 0 : index
    %173 = vector.load %arg5[%c0_39, %c0_40] : memref<32x32xf32, #tpu.memory_space<vmem>>, vector<32x32xf32>
    %cst_41 = arith.constant dense<0.000000e+00> : vector<64x32xf32>
    %174 = tpu.matmul %172, %173, %cst_41 {dimension_numbers = #tpu.dot_dimension_numbers<[1], [0], [0], [1], [0, 0, 1, 1], [], []>} : vector<64x32xf32>, vector<32x32xf32>, vector<64x32xf32> -> vector<64x32xf32>
    %c0_42 = arith.constant 0 : index
    %c0_43 = arith.constant 0 : index
    %175 = vector.load %arg6[%c0_42, %c0_43] : memref<1x32xf32, #tpu.memory_space<vmem>>, vector<1x32xf32>
    %176 = vector.broadcast %175 : vector<1x32xf32> to vector<64x32xf32>
    %177 = arith.addf %174, %176 : vector<64x32xf32>
    %cst_44 = arith.constant dense<0xFF800000> : vector<64xf32>
    %178 = vector.multi_reduction <maximumf>, %177, %cst_44 [1] : vector<64x32xf32> to vector<64xf32>
    %179 = vector.shape_cast %178 : vector<64xf32> to vector<64x1xf32>
    %180 = vector.broadcast %179 : vector<64x1xf32> to vector<64x32xf32>
    %181 = arith.subf %177, %180 : vector<64x32xf32>
    %182 = math.exp %181 : vector<64x32xf32>
    %cst_45 = arith.constant dense<0.000000e+00> : vector<64xf32>
    %183 = vector.multi_reduction <add>, %182, %cst_45 [1] : vector<64x32xf32> to vector<64xf32>
    %184 = vector.shape_cast %183 : vector<64xf32> to vector<64x1xf32>
    %185 = tpu.reciprocal %184 {approx = true} : vector<64x1xf32> -> vector<64x1xf32>
    %186 = vector.broadcast %185 : vector<64x1xf32> to vector<64x32xf32>
    %187 = arith.mulf %182, %186 : vector<64x32xf32>
    %c0_46 = arith.constant 0 : index
    %c0_47 = arith.constant 0 : index
    %c0_48 = arith.constant 0 : index
    %188 = vector.load %arg7[%c0_46, %c0_47, %c0_48] : memref<1x64x32xf32, #tpu.memory_space<vmem>>, vector<1x64x32xf32>
    %189 = vector.shape_cast %188 : vector<1x64x32xf32> to vector<64x32xf32>
    %190 = vector.shape_cast %187 : vector<64x32xf32> to vector<1x64x32xf32>
    tpu.vector_store %arg7[%c0_46, %c0_47, %c0_48], %190 {strides = array<i32>} : memref<1x64x32xf32, #tpu.memory_space<vmem>>, vector<1x64x32xf32>,
    %c0_49 = arith.constant 0 : index
    %c0_50 = arith.constant 0 : index
    %c0_51 = arith.constant 0 : index
    %c0_52 = arith.constant 0 : index
    %191 = vector.load %arg8[%c0_49, %c0_50, %c0_51, %c0_52] : memref<1x1x8x32xf32, #tpu.memory_space<vmem>>, vector<1x1x8x32xf32>
    %192 = vector.shape_cast %191 : vector<1x1x8x32xf32> to vector<8x32xf32>
    %193 = vector.shape_cast %170 : vector<8x32xf32> to vector<1x1x8x32xf32>
    tpu.vector_store %arg8[%c0_49, %c0_50, %c0_51, %c0_52], %193 {strides = array<i32>} : memref<1x1x8x32xf32, #tpu.memory_space<vmem>>, vector<1x1x8x32xf32>,
    %c0_53 = arith.constant 0 : index
    %c0_54 = arith.constant 0 : index
    %c0_55 = arith.constant 0 : index
    %c0_56 = arith.constant 0 : index
    %194 = vector.load %arg9[%c0_53, %c0_54, %c0_55, %c0_56] : memref<1x1x8x32xf32, #tpu.memory_space<vmem>>, vector<1x1x8x32xf32>
    %195 = vector.shape_cast %194 : vector<1x1x8x32xf32> to vector<8x32xf32>
    %196 = vector.shape_cast %167 : vector<8x32xf32> to vector<1x1x8x32xf32>
    tpu.vector_store %arg9[%c0_53, %c0_54, %c0_55, %c0_56], %196 {strides = array<i32>} : memref<1x1x8x32xf32, #tpu.memory_space<vmem>>, vector<1x1x8x32xf32>,
    return
  }
  func.func @transform_0(%arg0: i32) -> (i32, i32, i32) {
    %c0_i32 = arith.constant 0 : i32
    %c0_i32_0 = arith.constant 0 : i32
    %c0_i32_1 = arith.constant 0 : i32
    return %arg0, %c0_i32, %c0_i32_0 : i32, i32, i32
  }
  func.func @transform_1(%arg0: i32) -> (i32, i32, i32) {
    %c0_i32 = arith.constant 0 : i32
    %c0_i32_0 = arith.constant 0 : i32
    %c0_i32_1 = arith.constant 0 : i32
    return %arg0, %c0_i32, %c0_i32_0 : i32, i32, i32
  }
  func.func @transform_2(%arg0: i32) -> (i32, i32, i32) {
    %c0_i32 = arith.constant 0 : i32
    %c0_i32_0 = arith.constant 0 : i32
    %c0_i32_1 = arith.constant 0 : i32
    return %arg0, %c0_i32, %c0_i32_0 : i32, i32, i32
  }
  func.func @transform_3(%arg0: i32) -> (i32, i32) {
    %c0_i32 = arith.constant 0 : i32
    %c0_i32_0 = arith.constant 0 : i32
    %c0_i32_1 = arith.constant 0 : i32
    return %c0_i32, %c0_i32_0 : i32, i32
  }
  func.func @transform_4(%arg0: i32) -> (i32, i32) {
    %c0_i32 = arith.constant 0 : i32
    %c0_i32_0 = arith.constant 0 : i32
    %c0_i32_1 = arith.constant 0 : i32
    return %c0_i32, %c0_i32_0 : i32, i32
  }
  func.func @transform_5(%arg0: i32) -> (i32, i32) {
    %c0_i32 = arith.constant 0 : i32
    %c0_i32_0 = arith.constant 0 : i32
    %c0_i32_1 = arith.constant 0 : i32
    return %c0_i32, %c0_i32_0 : i32, i32
  }
  func.func @transform_6(%arg0: i32) -> (i32, i32, i32) {
    %c0_i32 = arith.constant 0 : i32
    %c0_i32_0 = arith.constant 0 : i32
    %c0_i32_1 = arith.constant 0 : i32
    return %arg0, %c0_i32, %c0_i32_0 : i32, i32, i32
  }
  func.func @transform_7(%arg0: i32) -> (i32, i32, i32, i32) {
    %c0_i32 = arith.constant 0 : i32
    %c0_i32_0 = arith.constant 0 : i32
    %c0_i32_1 = arith.constant 0 : i32
    %c0_i32_2 = arith.constant 0 : i32
    return %arg0, %c0_i32, %c0_i32_0, %c0_i32_1 : i32, i32, i32, i32
  }
  func.func @transform_8(%arg0: i32) -> (i32, i32, i32, i32) {
    %c0_i32 = arith.constant 0 : i32
    %c0_i32_0 = arith.constant 0 : i32
    %c0_i32_1 = arith.constant 0 : i32
    %c0_i32_2 = arith.constant 0 : i32
    return %arg0, %c0_i32, %c0_i32_0, %c0_i32_1 : i32, i32, i32, i32
  }
}

</mosaic_0001>

<bundles_post_ra>
// kernel: tpu_custom_call.1
= control target key start
LH: loop header
LB: loop body
LE: loop exit
PB: predicated region body
PF: predicated region fallthrough
CT: control target
= control target key end

     0   :  { %s2740_s0 = inlined_call_operand.vmem [shape: f32[3,64,16], index: 0, kind: input, shape index: {}]   ;;  %s2741_s1 = inlined_call_operand.vmem [shape: f32[3,16,128], index: 1, kind: input, shape index: {}]   ;;  %s2742_s2 = inlined_call_operand.vmem [shape: f32[3,1,128], index: 2, kind: input, shape index: {}]   ;;  %s2743_s3 = inlined_call_operand.vmem [shape: f32[32,128], index: 3, kind: input, shape index: {}]   ;;  %s2744_s4 = inlined_call_operand.vmem [shape: f32[32,32], index: 4, kind: input, shape index: {}]   ;;  %s2745_s5 = inlined_call_operand.vmem [shape: f32[1,32], index: 5, kind: input, shape index: {}]   ;;  %s2746_s6 = inlined_call_operand.vmem [shape: f32[3,64,32], index: 6, kind: output, shape index: {0}]   ;;  %s2747_s7 = inlined_call_operand.hbm [shape: f32[3,1,8,32], index: 7, kind: output, shape index: {1}]   ;;  %s2748_s8 = inlined_call_operand.hbm [shape: f32[3,1,8,32], index: 8, kind: output, shape index: {2}]  }
   0x1   :  { %2750 = sst [smem:[#allocation9_spill]] %s2740_s0 }
   0x2   :  { %14 = vsyncpa [#allocation4], 0 }
   0x3   :  { %16 = vsyncpa [#allocation4 + $0x1], 0 }
   0x4   :  { %17 = vsyncpa [#allocation6], 0 }
   0x5   :  { %19 = vsyncpa [#allocation6 + $0x1], 0  ;;  %s2354_s27 = smov 0   ;;  %s2356_s28 = smov 0  }
   0x6   :  { %s2358_s29 = smov 0   ;;  %s2360_s30 = smov 0  }
   0x7 LB: > { %s2375_s9 = sadd.s32 4294967295, %s2299_s30   ;;  %s1757_s10 = sadd.s32 4294967294, %s2299_s30   ;;  %s2299_s30 = sphi %s2360_s30, %s2758_s30   ;;  %s2295_s29 = sphi %s2358_s29, %s2757_s29   ;;  %s2291_s28 = sphi %s2356_s28, %s2756_s28   ;;  %s2287_s27 = sphi %s2354_s27, %s2755_s27  }
   0x8   : > { %s2379_s11 = sadd.s32 1, %s2299_s30   ;;  %s199_s12 = sadd.s32 1, %s2295_s29 }
   0x9   : > { %s196_s13 = ssub.s32 %s2299_s30, %s2379_s11  ;;  %p209_p0 = scmp.ne.s32.totalorder %s2295_s29, %s2291_s28 }
   0xa   : > { %p197_p1 = scmp.eq.s32.totalorder %s196_s13, 0  ;;  %p210_p2 = scmp.eq.s32.totalorder %s2375_s9, 2 }
   0xb   : > { %p215_p3 = scmp.ne.s32.totalorder %s2291_s28, %s2287_s27  ;;  %p216_p4 = scmp.eq.s32.totalorder %s1757_s10, 2 }
   0xc   : > { %s2390_s14 = scalar_select %p197_p1, %s2295_s29, %s199_s12  }
   0xd   : > { %p2392_p5 = por %p210_p2, %p209_p0  ;;  %p2396_p6 = por %p216_p4, %p215_p3 }
   0xe   : > { %p1760_p7 = scmp.ge.s32.totalorder %s2299_s30, 1  ;;  %p291_p8 = scmp.lt.s32.totalorder %s2299_s30, 4 }
  0x10   : > { %p292_p9 = pnand %p1760_p7, %p291_p8 }
  0x11   : > { %p343_p10 = scmp.lt.s32.totalorder (!%p292_p9), %s2375_s9, 2  ;;  %vm378_vm0 = vcmask (!%p292_p9), 130048   ;;  %s2753_s0 = sld [smem:[#allocation9_spill]] (!%p292_p9)  ;;  %v508_v4 = vld [vmem:[%s2743_s3] sm:$0xff] (!%p292_p9)  ;;  %v509_v5 = vld [vmem:[%s2743_s3 + $0x8] sm:$0xff] (!%p292_p9)  ;;  %v2301_v10 = vmov (!%p292_p9), 0.0|0.0  }
  0x12   : > { %295 = sbr.rel (%p292_p9) target bundleno = 6206 (0x183e), region = 44  ;;  %v2429_v8 = vpack.c.bf16 (!%p292_p9), %v509_v5, %v508_v4  ;;  %v510_v12 = vld [vmem:[%s2743_s3 + $0x10] sm:$0xff] (!%p292_p9)  ;;  %v511_v13 = vld [vmem:[%s2743_s3 + $0x18] sm:$0xff] (!%p292_p9)  ;;  %vm2302_vm1 = vmmov (!%p292_p9), 0   ;;  %v2303_v16 = vmov (!%p292_p9), 0.0   ;;  %s2304_s10 = smov (!%p292_p9), 32  }
  0x13   : > { %v2446_v15 = vpack.c.bf16 (!%p292_p9), %v511_v13, %v510_v12  ;;  %s2305_s12 = smov (!%p292_p9), 64   ;;  %vm512_vm2 = vcmask (!%p292_p9), 261120   ;;  %s2307_s20 = smov (!%p292_p9), [#allocation3]  }
  0x19   : > { %s2404_s17 = scalar_select %p343_p10, %s2375_s9, 2 }
  0x1b   : > { %s1809_s18 = sshll.u32 %s2404_s17, 4  ;;  %s1808_s19 = sshll.u32 %s2404_s17, 6 }
  0x1c   : > { %s352_s22 = scalar_lea.vmem %s2741_s1, %s1809_s18  ;;  %s2416_s25 = scalar_lea.vmem %s2753_s0, %s1808_s19 }
  0x1d   : > { %v369_v0 = vld [vmem:[%s352_s22] sm:$0xff]  ;;  %v370_v1 = vld [vmem:[%s352_s22 + $0x8] sm:$0xff]  ;;  %v367_v11 = vld [vmem:[%s2416_s25 + $0x30] sm:$0xff]  ;;  %s355_s26 = scalar_lea.vmem %s2742_s2, %s2404_s17  ;;  %s2639_s21 = scalar_lea.vmem %s2746_s6, %s1808_s19 }
  0x1e   : > { %v365_v2 = vld [vmem:[%s2416_s25 + $0x20] sm:$0xff]  ;;  %v1997_v3 = vpack.c.bf16 %v370_v1, %v369_v0  ;;  %v366_v7 = vld [vmem:[%s2416_s25 + $0x28] sm:$0xff]  ;;  %v368_v14 = vld [vmem:[%s2416_s25 + $0x38] sm:$0xff]  ;;  %s2306_s17 = smov 96   ;;  %s1804_s19 = sshll.u32 %s2375_s9, 7 }
  0x1f   : > { %1883 = vmatprep.mubr.msk.f32.mxu1 %vm378_vm0, %v365_v2  ;;  %v361_v6 = vld [vmem:[%s2416_s25] sm:$0xff]  ;;  %v362_v9 = vld [vmem:[%s2416_s25 + $0x8] sm:$0xff]  ;;  %v363_v56 = vld [vmem:[%s2416_s25 + $0x10] sm:$0xff]  ;;  %s2662_s24 = scalar_lea.hbm %s2747_s7, %s1804_s19 }
  0x20   : > { %1877 = vmatprep.mubr.msk.f32.mxu0 %vm378_vm0, %v361_v6  ;;  %2057 = vmatprep.subr.bf16.mxu1 %v1997_v3  ;;  %v2473_v21 = vld [vmem:[%s355_s26] ss:$0 sm:$0xff]  ;;  %v364_v57 = vld [vmem:[%s2416_s25 + $0x18] sm:$0xff] }
  0x21   : > { %1998 = vmatprep.subr.bf16.mxu0 %v1997_v3  ;;  %2058 = vmatpush3.bf16.msra.mxu1 %v1997_v3 }
  0x22   : > { %2000 = vmatpush3.bf16.msra.mxu0 %v1997_v3  ;;  %2001 = vmatprep.subr.bf16.mxu1 %v2301_v10 }
  0x23   : > { %2013 = vmatprep.subr.bf16.mxu0 %v2301_v10 }
  0x24   : > { %1884 = vmatmul.mubr.msk.f32.vlgmr.msra.gmra.mrb[0].mxu1 %vm378_vm0, %v366_v7 }
  0x25   : > { %1878 = vmatmul.mubr.msk.f32.vlgmr.msra.gmra.mrb[0].mxu0 %vm378_vm0, %v362_v9  ;;  %2003 = vmatpush3.bf16.msra.mxu1 %v2429_v8 }
  0x26   : > { %1886 = vmatprep.mubr.msk.f32.mxu1 %vm378_vm0, %v367_v11  ;;  %2004 = vmatprep.subr.bf16.mxu1 %v2301_v10 }
  0x27   : > { %2015 = vmatpush3.bf16.msra.mxu0 %v2429_v8  ;;  %1880 = vmatprep.mubr.msk.f32.mxu0 %vm378_vm0, %v363_v56 }
  0x28   : > { %2016 = vmatprep.subr.bf16.mxu0 %v2301_v10  ;;  %1887 = vmatmul.mubr.msk.f32.gmra.mrb[2].mxu1 %vm378_vm0, %v368_v14 }
  0x29   : > { %2006 = vmatpush3.bf16.msra.mxu1 %v2446_v15  ;;  %1897 = vmatprep.mubr.msk.f32.mxu1 %vm2302_vm1, %v2303_v16 }
  0x2a   : > { %2007 = vmatprep.subr.bf16.mxu1 %v2301_v10  ;;  %1881 = vmatmul.mubr.msk.f32.gmra.mrb[2].mxu0 %vm378_vm0, %v364_v57 }
  0x2b   : > { %2018 = vmatpush3.bf16.msra.mxu0 %v2446_v15  ;;  %1919 = vmatprep.mubr.msk.f32.mxu0 %vm2302_vm1, %v2303_v16 }
  0x2c   : > { %2025 = vmatprep.subr.bf16.mxu0 %v2301_v10  ;;  %1898 = vmatmul.mubr.f32.vlgmr.msra.gmra.mrb[4].mxu1 %v2303_v16 }
  0x2d   : > { %2009 = vmatpush3.bf16.msra.mxu1 %v2429_v8  ;;  %1908 = vmatprep.mubr.msk.f32.mxu1 %vm2302_vm1, %v2303_v16 }
  0x2e   : > { %2010 = vmatprep.subr.bf16.mxu1 %v2301_v10 }
  0x31   : > { %2012 = vmatpush3.bf16.msra.mxu1 %v2446_v15 }
  0x32   : > { %2019 = vmatprep.subr.bf16.mxu1 %v2301_v10 }
  0xf7   : > { %v2465_v17 = vpop.f32.mrb[0].mxu1 }
  0xf8   : > { %v1879_v18 = vpop.f32.mrb[0].mxu0  ;;  %v2471_v19 = vpop.f32.mrb[1].mxu1 }
  0xf9   : > { %v469_v20 = vpop.f32.mrb[1].mxu0  ;;  %v475_v42 = vadd.f32 %v1879_v18, %v2473_v21 }
  0xfa   : > { %v470_v24 = vadd.f32 %v2473_v21, %v469_v20 }
  0xfb   : > { %v2475_v22 = vpop.f32.mrb[2].mxu1 }
  0xfc   : > { %v2477_v23 = vpop.f32.mrb[3].mxu1 }
  0xfd   : > { %v1882_v61 = vpop.f32.mrb[2].mxu0 }
  0xfe   : > { %v479_v62 = vpop.f32.mrb[3].mxu0 }
  0xff   : > { %v582_v25 = vpop.f32.mrb[4].mxu1  ;;  %v480_v0 = vadd.f32 %v2473_v21, %v479_v62  ;;  %v495_v62 = vadd.f32 %v2465_v17, %v2473_v21 }
 0x100   : > { %v586_v26 = vadd.f32 %v582_v25, %v470_v24  ;;  %v1899_v27 = vpop.f32.mrb[5].mxu1 }
 0x101   : > { %v485_v27 = vadd.f32 %v1882_v61, %v2473_v21 }
 0x102   : > { %2109 = vtanh.f32 %v586_v26  ;;  %v1778_v29 = vmul.f32 -1.442695, %v586_v26 }
 0x104   : > { %2111 = vpow2.f32 %v1778_v29 }
 0x10c   : > { %v2110_v28 = vpop.eup %2109 }
 0x10d   : > { %596 = vrot.lane.b32.xlu0 %v2110_v28, %s2304_s10 }
 0x10e   : > { %v2112_v30 = vpop.eup %2111 }
 0x10f   : > { %v590_v31 = vadd.f32 1.0, %v2112_v30 }
 0x111   : > { %2113 = vrcp.f32 %v590_v31 }
 0x11b   : > { %v2114_v32 = vpop.eup %2113 }
 0x11c   : > { %v594_v35 = vmul.f32 0.0, %v2114_v32 }
 0x17f   : > { %v597_v33 = vpop.permute.xlu0 %596 }
 0x180   : > { %v599_v34 = vmul.f32 %v2114_v32, %v597_v33 }
 0x182   : > { %601 = vrot.lane.b32.xlu0 %v599_v34, %s2304_s10 }
 0x1f4   : > { %v602_v36 = vpop.permute.xlu0 %601 }
 0x1f5   : > { %v604_v37 = vadd.f32 %v602_v36, %v594_v35 }
 0x1f7   : > { %2115 = vtanh.f32 %v604_v37 }
 0x201   : > { %v2116_v38 = vpop.eup %2115 }
 0x202   : > { %607 = vrot.lane.b32.xlu1 %v2116_v38, %s2304_s10 }
 0x274   : > { %v608_v39 = vpop.permute.xlu1 %607 }
 0x275   : > { %v610_v40 = vmul.f32 %v2114_v32, %v608_v39 }
 0x277   : > { %612 = vrot.lane.b32.xlu1 %v610_v40, %s2305_s12 }
 0x2e9   : > { %v613_v41 = vpop.permute.xlu1 %612 }
 0x2ea   : > { %615 = vst.msk [vmem:[#allocation2] sm:$0xff] %vm512_vm2, %v613_v41  ;;  %1909 = vmatmul.mubr.msk.f32.vlgmr.msra.gmra.mrb[6].mxu1 %vm512_vm2, %v613_v41 }
 0x2eb   : > { %2021 = vmatpush3.bf16.msra.mxu1 %v2429_v8  ;;  %1930 = vmatprep.mubr.msk.f32.mxu1 %vm2302_vm1, %v2303_v16 }
 0x2ec   : > { %2022 = vmatprep.subr.bf16.mxu1 %v2301_v10 }
 0x2ef   : > { %2024 = vmatpush3.bf16.msra.mxu1 %v2446_v15 }
 0x2f0   : > { %2031 = vmatprep.subr.bf16.mxu1 %v2301_v10 }
 0x3bd   : > { %v684_v43 = vpop.f32.mrb[6].mxu1 }
 0x3be   : > { %v688_v44 = vadd.f32 %v684_v43, %v475_v42  ;;  %v1910_v45 = vpop.f32.mrb[7].mxu1 }
 0x3bf   : > { %v490_v45 = vadd.f32 %v2473_v21, %v2471_v19 }
 0x3c0   : > { %2117 = vtanh.f32 %v688_v44  ;;  %v1780_v47 = vmul.f32 -1.442695, %v688_v44 }
 0x3c2   : > { %2119 = vpow2.f32 %v1780_v47 }
 0x3ca   : > { %v2118_v46 = vpop.eup %2117 }
 0x3cb   : > { %698 = vrot.lane.b32.xlu0 %v2118_v46, %s2304_s10 }
 0x3cc   : > { %v2120_v48 = vpop.eup %2119 }
 0x3cd   : > { %v692_v49 = vadd.f32 1.0, %v2120_v48 }
 0x3cf   : > { %2121 = vrcp.f32 %v692_v49 }
 0x3d9   : > { %v2122_v50 = vpop.eup %2121 }
 0x3da   : > { %v696_v53 = vmul.f32 %v2122_v50, %v604_v37 }
 0x43d   : > { %v699_v51 = vpop.permute.xlu0 %698 }
 0x43e   : > { %v701_v52 = vmul.f32 %v2122_v50, %v699_v51 }
 0x440   : > { %703 = vrot.lane.b32.xlu1 %v701_v52, %s2304_s10 }
 0x4b2   : > { %v704_v54 = vpop.permute.xlu1 %703 }
 0x4b3   : > { %v706_v55 = vadd.f32 %v704_v54, %v696_v53 }
 0x4b5   : > { %2123 = vtanh.f32 %v706_v55 }
 0x4bf   : > { %v2124_v58 = vpop.eup %2123 }
 0x4c0   : > { %709 = vrot.lane.b32.xlu0 %v2124_v58, %s2304_s10 }
 0x532   : > { %v710_v59 = vpop.permute.xlu0 %709 }
 0x533   : > { %v712_v60 = vmul.f32 %v2122_v50, %v710_v59 }
 0x535   : > { %714 = vrot.lane.b32.xlu1 %v712_v60, %s2305_s12 }
 0x5a7   : > { %v715_v63 = vpop.permute.xlu1 %714 }
 0x5a8   : > { %717 = vst.msk [vmem:[#allocation2 + $0x8] sm:$0xff] %vm512_vm2, %v715_v63  ;;  %1920 = vmatmul.mubr.msk.f32.vlgmr.msra.gmra.mrb[4].mxu0 %vm512_vm2, %v715_v63 }
 0x5a9   : > { %2027 = vmatpush3.bf16.msra.mxu0 %v2429_v8  ;;  %1941 = vmatprep.mubr.msk.f32.mxu0 %vm2302_vm1, %v2303_v16 }
 0x5aa   : > { %2028 = vmatprep.subr.bf16.mxu0 %v2301_v10 }
 0x5ad   : > { %2030 = vmatpush3.bf16.msra.mxu0 %v2446_v15 }
 0x5ae   : > { %2037 = vmatprep.subr.bf16.mxu0 %v2301_v10 }
 0x67b   : > { %v786_v1 = vpop.f32.mrb[4].mxu0 }
 0x67c   : > { %v790_v2 = vadd.f32 %v786_v1, %v480_v0  ;;  %v1921_v3 = vpop.f32.mrb[5].mxu0 }
 0x67e   : > { %2125 = vtanh.f32 %v790_v2  ;;  %v1782_v5 = vmul.f32 -1.442695, %v790_v2 }
 0x680   : > { %2127 = vpow2.f32 %v1782_v5 }
 0x688   : > { %v2126_v4 = vpop.eup %2125 }
 0x689   : > { %800 = vrot.lane.b32.xlu0 %v2126_v4, %s2304_s10 }
 0x68a   : > { %v2128_v6 = vpop.eup %2127 }
 0x68b   : > { %v794_v7 = vadd.f32 1.0, %v2128_v6 }
 0x68d   : > { %2129 = vrcp.f32 %v794_v7  ;;  %v1338_v7 = vld [vmem:[%s2744_s4] sm:$0xff] }
 0x697   : > { %v2130_v9 = vpop.eup %2129 }
 0x698   : > { %v798_v13 = vmul.f32 %v2130_v9, %v706_v55 }
 0x6fb   : > { %v801_v11 = vpop.permute.xlu0 %800 }
 0x6fc   : > { %v803_v12 = vmul.f32 %v2130_v9, %v801_v11 }
 0x6fe   : > { %805 = vrot.lane.b32.xlu1 %v803_v12, %s2304_s10 }
 0x770   : > { %v806_v14 = vpop.permute.xlu1 %805 }
 0x771   : > { %v808_v18 = vadd.f32 %v806_v14, %v798_v13 }
 0x773   : > { %2131 = vtanh.f32 %v808_v18 }
 0x77d   : > { %v2132_v20 = vpop.eup %2131 }
 0x77e   : > { %811 = vrot.lane.b32.xlu0 %v2132_v20, %s2304_s10  ;;  %v1341_v20 = vld [vmem:[%s2744_s4 + $0x18] sm:$0xff] }
 0x7f0   : > { %v812_v24 = vpop.permute.xlu0 %811 }
 0x7f1   : > { %v814_v25 = vmul.f32 %v2130_v9, %v812_v24  ;;  %v1339_v9 = vld [vmem:[%s2744_s4 + $0x8] sm:$0xff] }
 0x7f2   : > { %v2049_v11 = vpack.c.bf16 %v1339_v9, %v1338_v7 }
 0x7f3   : > { %816 = vrot.lane.b32.xlu1 %v814_v25, %s2305_s12 }
 0x865   : > { %v817_v26 = vpop.permute.xlu1 %816 }
 0x866   : > { %819 = vst.msk [vmem:[#allocation2 + $0x10] sm:$0xff] %vm512_vm2, %v817_v26  ;;  %1931 = vmatmul.mubr.msk.f32.vlgmr.msra.gmra.mrb[8].mxu1 %vm512_vm2, %v817_v26  ;;  %v1330_v26 = vld [vmem:[#allocation2] sm:$0xff] }
 0x867   : > { %2033 = vmatpush3.bf16.msra.mxu1 %v2429_v8  ;;  %1952 = vmatprep.mubr.msk.f32.mxu1 %vm2302_vm1, %v2303_v16 }
 0x868   : > { %2034 = vmatprep.subr.bf16.mxu1 %v2301_v10 }
 0x86b   : > { %2036 = vmatpush3.bf16.msra.mxu1 %v2446_v15 }
 0x86c   : > { %2043 = vmatprep.subr.bf16.mxu1 %v2301_v10 }
 0x939   : > { %v888_v28 = vpop.f32.mrb[8].mxu1 }
 0x93a   : > { %v892_v29 = vadd.f32 %v888_v28, %v485_v27  ;;  %v1932_v30 = vpop.f32.mrb[9].mxu1  ;;  %v1331_v27 = vld [vmem:[#allocation2 + $0x8] sm:$0xff]  ;;  %v1332_v28 = vld [vmem:[#allocation2 + $0x10] sm:$0xff] }
 0x93c   : > { %2133 = vtanh.f32 %v892_v29  ;;  %v1784_v32 = vmul.f32 -1.442695, %v892_v29 }
 0x93e   : > { %2135 = vpow2.f32 %v1784_v32  ;;  %v500_v32 = vadd.f32 %v2473_v21, %v2477_v23 }
 0x946   : > { %v2134_v31 = vpop.eup %2133 }
 0x947   : > { %902 = vrot.lane.b32.xlu0 %v2134_v31, %s2304_s10 }
 0x948   : > { %v2136_v33 = vpop.eup %2135 }
 0x949   : > { %v896_v34 = vadd.f32 1.0, %v2136_v33 }
 0x94b   : > { %2137 = vrcp.f32 %v896_v34 }
 0x955   : > { %v2138_v35 = vpop.eup %2137 }
 0x956   : > { %v900_v38 = vmul.f32 %v2138_v35, %v808_v18  ;;  %v1340_v18 = vld [vmem:[%s2744_s4 + $0x10] sm:$0xff] }
 0x957   : > { %v2053_v24 = vpack.c.bf16 %v1341_v20, %v1340_v18 }
 0x9b9   : > { %v903_v36 = vpop.permute.xlu0 %902 }
 0x9ba   : > { %v905_v37 = vmul.f32 %v2138_v35, %v903_v36 }
 0x9bc   : > { %907 = vrot.lane.b32.xlu1 %v905_v37, %s2304_s10 }
 0xa2e   : > { %v908_v39 = vpop.permute.xlu1 %907 }
 0xa2f   : > { %v910_v40 = vadd.f32 %v908_v39, %v900_v38 }
 0xa31   : > { %2139 = vtanh.f32 %v910_v40 }
 0xa3b   : > { %v2140_v41 = vpop.eup %2139 }
 0xa3c   : > { %913 = vrot.lane.b32.xlu0 %v2140_v41, %s2304_s10 }
 0xaae   : > { %v914_v42 = vpop.permute.xlu0 %913 }
 0xaaf   : > { %v916_v43 = vmul.f32 %v2138_v35, %v914_v42 }
 0xab1   : > { %918 = vrot.lane.b32.xlu1 %v916_v43, %s2305_s12 }
 0xb23   : > { %v919_v44 = vpop.permute.xlu1 %918 }
 0xb24   : > { %921 = vst.msk [vmem:[#allocation2 + $0x18] sm:$0xff] %vm512_vm2, %v919_v44  ;;  %1942 = vmatmul.mubr.msk.f32.vlgmr.msra.gmra.mrb[6].mxu0 %vm512_vm2, %v919_v44 }
 0xb25   : > { %2039 = vmatpush3.bf16.msra.mxu0 %v2429_v8  ;;  %1963 = vmatprep.mubr.msk.f32.mxu0 %vm2302_vm1, %v2303_v16 }
 0xb26   : > { %2040 = vmatprep.subr.bf16.mxu0 %v2301_v10 }
 0xb29   : > { %2042 = vmatpush3.bf16.msra.mxu0 %v2446_v15 }
 0xb2a   : > { %2050 = vmatprep.subr.bf16.mxu0 %v2049_v11 }
 0xb2b   : > { %v1333_v29 = vld [vmem:[#allocation2 + $0x18] sm:$0xff] }
 0xbf7   : > { %v990_v46 = vpop.f32.mrb[6].mxu0 }
 0xbf8   : > { %v994_v47 = vadd.f32 %v990_v46, %v490_v45  ;;  %v1943_v48 = vpop.f32.mrb[7].mxu0 }
 0xbfa   : > { %2141 = vtanh.f32 %v994_v47  ;;  %v1786_v50 = vmul.f32 -1.442695, %v994_v47 }
 0xbfc   : > { %2143 = vpow2.f32 %v1786_v50 }
 0xc04   : > { %v2142_v49 = vpop.eup %2141 }
 0xc05   : > { %1004 = vrot.lane.b32.xlu0 %v2142_v49, %s2304_s10 }
 0xc06   : > { %v2144_v51 = vpop.eup %2143 }
 0xc07   : > { %v998_v52 = vadd.f32 1.0, %v2144_v51 }
 0xc09   : > { %2145 = vrcp.f32 %v998_v52 }
 0xc13   : > { %v2146_v53 = vpop.eup %2145 }
 0xc14   : > { %v1002_v56 = vmul.f32 %v2146_v53, %v910_v40 }
 0xc77   : > { %v1005_v54 = vpop.permute.xlu0 %1004 }
 0xc78   : > { %v1007_v55 = vmul.f32 %v2146_v53, %v1005_v54 }
 0xc7a   : > { %1009 = vrot.lane.b32.xlu1 %v1007_v55, %s2304_s10 }
 0xcec   : > { %v1010_v57 = vpop.permute.xlu1 %1009 }
 0xced   : > { %v1012_v19 = vadd.f32 %v1010_v57, %v1002_v56  ;;  %v505_v56 = vadd.f32 %v2475_v22, %v2473_v21 }
 0xcef   : > { %2147 = vtanh.f32 %v1012_v19 }
 0xcf9   : > { %v2148_v58 = vpop.eup %2147 }
 0xcfa   : > { %1015 = vrot.lane.b32.xlu0 %v2148_v58, %s2304_s10 }
 0xd6c   : > { %v1016_v59 = vpop.permute.xlu0 %1015 }
 0xd6d   : > { %v1018_v60 = vmul.f32 %v2146_v53, %v1016_v59 }
 0xd6f   : > { %1020 = vrot.lane.b32.xlu1 %v1018_v60, %s2305_s12 }
 0xde1   : > { %v1021_v61 = vpop.permute.xlu1 %1020 }
 0xde2   : > { %1023 = vst.msk [vmem:[#allocation2 + $0x20] sm:$0xff] %vm512_vm2, %v1021_v61  ;;  %1953 = vmatmul.mubr.msk.f32.vlgmr.msra.gmra.mrb[10].mxu1 %vm512_vm2, %v1021_v61 }
 0xde3   : > { %2045 = vmatpush3.bf16.msra.mxu1 %v2429_v8  ;;  %1974 = vmatprep.mubr.msk.f32.mxu1 %vm2302_vm1, %v2303_v16 }
 0xde4   : > { %2046 = vmatprep.subr.bf16.mxu1 %v2301_v10 }
 0xde7   : > { %2048 = vmatpush3.bf16.msra.mxu1 %v2446_v15 }
 0xde9   : > { %v1334_v30 = vld [vmem:[#allocation2 + $0x20] sm:$0xff] }
 0xeb5   : > { %v1092_v63 = vpop.f32.mrb[10].mxu1 }
 0xeb6   : > { %v1096_v0 = vadd.f32 %v1092_v63, %v495_v62  ;;  %v1954_v1 = vpop.f32.mrb[11].mxu1 }
 0xeb8   : > { %2149 = vtanh.f32 %v1096_v0  ;;  %v1788_v3 = vmul.f32 -1.442695, %v1096_v0 }
 0xeba   : > { %2151 = vpow2.f32 %v1788_v3 }
 0xec2   : > { %v2150_v2 = vpop.eup %2149 }
 0xec3   : > { %1106 = vrot.lane.b32.xlu0 %v2150_v2, %s2304_s10 }
 0xec4   : > { %v2152_v8 = vpop.eup %2151 }
 0xec5   : > { %v1100_v4 = vadd.f32 1.0, %v2152_v8  ;;  %v1793_v8 = vld [vmem:[%s2745_s5] ss:$0 sm:$0xff] }
 0xec7   : > { %2153 = vrcp.f32 %v1100_v4 }
 0xed1   : > { %v2154_v16 = vpop.eup %2153 }
 0xed2   : > { %v1104_v15 = vmul.f32 %v2154_v16, %v1012_v19 }
 0xf35   : > { %v1107_v5 = vpop.permute.xlu0 %1106 }
 0xf36   : > { %v1109_v10 = vmul.f32 %v2154_v16, %v1107_v5 }
 0xf38   : > { %1111 = vrot.lane.b32.xlu1 %v1109_v10, %s2304_s10 }
 0xfaa   : > { %v1112_v6 = vpop.permute.xlu1 %1111 }
 0xfab   : > { %v1114_v17 = vadd.f32 %v1112_v6, %v1104_v15 }
 0xfad   : > { %2155 = vtanh.f32 %v1114_v17 }
 0xfb7   : > { %v2156_v12 = vpop.eup %2155 }
 0xfb8   : > { %1117 = vrot.lane.b32.xlu0 %v2156_v12, %s2304_s10 }
0x102a   : > { %v1118_v13 = vpop.permute.xlu0 %1117 }
0x102b   : > { %v1120_v14 = vmul.f32 %v2154_v16, %v1118_v13 }
0x102d   : > { %1122 = vrot.lane.b32.xlu1 %v1120_v14, %s2305_s12 }
0x109f   : > { %v1123_v25 = vpop.permute.xlu1 %1122 }
0x10a0   : > { %1125 = vst.msk [vmem:[#allocation2 + $0x28] sm:$0xff] %vm512_vm2, %v1123_v25  ;;  %1964 = vmatmul.mubr.msk.f32.vlgmr.msra.gmra.mrb[8].mxu0 %vm512_vm2, %v1123_v25 }
0x10a1   : > { %2052 = vmatpush3.bf16.msra.mxu0 %v2049_v11  ;;  %1985 = vmatprep.mubr.msk.f32.mxu0 %vm512_vm2, %v1330_v26 }
0x10a2   : > { %2054 = vmatprep.subr.bf16.mxu0 %v2053_v24 }
0x10a5   : > { %2056 = vmatpush3.bf16.msra.mxu0 %v2053_v24 }
0x10a7   : > { %v1335_v31 = vld [vmem:[#allocation2 + $0x28] sm:$0xff] }
0x10a8   : > { %1986 = vmatmul.mubr.msk.f32.vlgmr.msra.gmra.mrb[10].mxu0 %vm512_vm2, %v1331_v27 }
0x10a9   : > { %1988 = vmatprep.mubr.msk.f32.mxu0 %vm512_vm2, %v1332_v28 }
0x10ac   : > { %1989 = vmatmul.mubr.msk.f32.gmra.mrb[12].mxu0 %vm512_vm2, %v1333_v29 }
0x10ad   : > { %1991 = vmatprep.mubr.msk.f32.mxu0 %vm512_vm2, %v1334_v30 }
0x10b0   : > { %1992 = vmatmul.mubr.msk.f32.gmra.mrb[14].mxu0 %vm512_vm2, %v1335_v31 }
0x1173   : > { %v1194_v33 = vpop.f32.mrb[8].mxu0 }
0x1174   : > { %v1198_v34 = vadd.f32 %v1194_v33, %v500_v32  ;;  %v1965_v35 = vpop.f32.mrb[9].mxu0 }
0x1176   : > { %2157 = vtanh.f32 %v1198_v34  ;;  %v1790_v43 = vmul.f32 -1.442695, %v1198_v34 }
0x1178   : > { %2159 = vpow2.f32 %v1790_v43 }
0x117b   : > { %v2577_v36 = vpop.f32.mrb[10].mxu0 }
0x117c   : > { %v1439_v37 = vpop.f32.mrb[11].mxu0  ;;  %v1445_v12 = vadd.f32 %v2577_v36, %v1793_v8 }
0x117d   : > { %v1440_v4 = vadd.f32 %v1793_v8, %v1439_v37 }
0x117e   : > { %v1481_v14 = vsel %vm512_vm2, %v1445_v12, -inf }
0x117f   : > { %v1990_v38 = vpop.f32.mrb[12].mxu0  ;;  %v1478_v5 = vsel %vm512_vm2, %v1440_v4, -inf }
0x1180   : > { %v2158_v39 = vpop.eup %2157  ;;  %v1449_v40 = vpop.f32.mrb[13].mxu0  ;;  %v1455_v10 = vadd.f32 %v1990_v38, %v1793_v8 }
0x1181   : > { %1208 = vrot.lane.b32.xlu0 %v2158_v39, %s2304_s10  ;;  %v1450_v16 = vadd.f32 %v1793_v8, %v1449_v40 }
0x1182   : > { %v2160_v44 = vpop.eup %2159 }
0x1183   : > { %v1993_v41 = vpop.f32.mrb[14].mxu0  ;;  %v1202_v45 = vadd.f32 1.0, %v2160_v44  ;;  %v1484_v15 = vsel %vm512_vm2, %v1450_v16, -inf }
0x1184   : > { %v2580_v42 = vpop.f32.mrb[15].mxu0  ;;  %v1465_v6 = vadd.f32 %v1993_v41, %v1793_v8 }
0x1185   : > { %2161 = vrcp.f32 %v1202_v45  ;;  %v1460_v13 = vadd.f32 %v1793_v8, %v2580_v42 }
0x1186   : > { %v1493_v7 = vsel %vm512_vm2, %v1465_v6, -inf }
0x1187   : > { %v1490_v18 = vsel %vm512_vm2, %v1460_v13, -inf }
0x118f   : > { %v2162_v23 = vpop.eup %2161 }
0x1190   : > { %v1206_v48 = vmul.f32 %v2162_v23, %v1114_v17  ;;  %v1487_v17 = vsel %vm512_vm2, %v1455_v10, -inf }
0x11f3   : > { %v1209_v46 = vpop.permute.xlu0 %1208 }
0x11f4   : > { %v1211_v47 = vmul.f32 %v2162_v23, %v1209_v46 }
0x11f6   : > { %1213 = vrot.lane.b32.xlu1 %v1211_v47, %s2304_s10 }
0x1268   : > { %v1214_v49 = vpop.permute.xlu1 %1213 }
0x1269   : > { %v1216_v50 = vadd.f32 %v1214_v49, %v1206_v48 }
0x126b   : > { %2163 = vtanh.f32 %v1216_v50 }
0x1275   : > { %v2164_v51 = vpop.eup %2163 }
0x1276   : > { %1219 = vrot.lane.b32.xlu0 %v2164_v51, %s2304_s10 }
0x12e8   : > { %v1220_v52 = vpop.permute.xlu0 %1219 }
0x12e9   : > { %v1222_v53 = vmul.f32 %v2162_v23, %v1220_v52 }
0x12eb   : > { %1224 = vrot.lane.b32.xlu1 %v1222_v53, %s2305_s12 }
0x135d   : > { %v1225_v54 = vpop.permute.xlu1 %1224 }
0x135e   : > { %1227 = vst.msk [vmem:[#allocation2 + $0x30] sm:$0xff] %vm512_vm2, %v1225_v54  ;;  %1975 = vmatmul.mubr.msk.f32.vlgmr.msra.gmra.mrb[12].mxu1 %vm512_vm2, %v1225_v54 }
0x1365   : > { %v1336_v55 = vld [vmem:[#allocation2 + $0x30] sm:$0xff] }
0x1366   : > { %1994 = vmatprep.mubr.msk.f32.mxu0 %vm512_vm2, %v1336_v55 }
0x1431   : > { %v1296_v57 = vpop.f32.mrb[12].mxu1 }
0x1432   : > { %v1300_v19 = vadd.f32 %v1296_v57, %v505_v56  ;;  %v1976_v58 = vpop.f32.mrb[13].mxu1 }
0x1434   : > { %2165 = vtanh.f32 %v1300_v19  ;;  %v1792_v60 = vmul.f32 -1.442695, %v1300_v19 }
0x1436   : > { %2167 = vpow2.f32 %v1792_v60 }
0x143e   : > { %v2166_v59 = vpop.eup %2165 }
0x143f   : > { %1310 = vrot.lane.b32.xlu0 %v2166_v59, %s2304_s10 }
0x1440   : > { %v2168_v61 = vpop.eup %2167 }
0x1441   : > { %v1304_v62 = vadd.f32 1.0, %v2168_v61 }
0x1443   : > { %2169 = vrcp.f32 %v1304_v62 }
0x144d   : > { %v2170_v63 = vpop.eup %2169 }
0x144e   : > { %v1308_v2 = vmul.f32 %v2170_v63, %v1216_v50 }
0x14b1   : > { %v1311_v0 = vpop.permute.xlu0 %1310 }
0x14b2   : > { %v1313_v1 = vmul.f32 %v2170_v63, %v1311_v0 }
0x14b4   : > { %1315 = vrot.lane.b32.xlu1 %v1313_v1, %s2304_s10 }
0x1526   : > { %v1316_v3 = vpop.permute.xlu1 %1315 }
0x1527   : > { %v2592_v21 = vadd.f32 %v1316_v3, %v1308_v2 }
0x1529   : > { %2171 = vtanh.f32 %v2592_v21 }
0x1533   : > { %v2172_v22 = vpop.eup %2171 }
0x1534   : > { %1321 = vrot.lane.b32.xlu0 %v2172_v22, %s2304_s10  ;;  %s2609_s10 = sand.u32 1, %s2291_s28  }
0x1535   : > { %s2749_s13 = sshll.u32 %s2609_s10, 3  ;;  %s1586_s25 = scalar_lea.sflag [#allocation4], %s2609_s10 }
0x1553   : > { %1479 = vmax.xlane.f32.xlu0 %v1478_v5 }
0x1557   : > { %1485 = vmax.xlane.f32.xlu0 %v1484_v15 }
0x155b   : > { %1488 = vmax.xlane.f32.xlu0 %v1487_v17 }
0x155f   : > { %1494 = vmax.xlane.f32.xlu0 %v1493_v7 }
0x15a6   : > { %v1322_v9 = vpop.permute.xlu0 %1321 }
0x15a7   : > { %v1324_v11 = vmul.f32 %v2170_v63, %v1322_v9 }
0x15a9   : > { %1326 = vrot.lane.b32.xlu1 %v1324_v11, %s2305_s12  ;;  %s2615_s12 = scalar_lea.vmem [#allocation3], %s2749_s13  ;;  %s2209_s13 = sshll.u32 %s2307_s20, 4  ;;  %s2210_s13 = int_to_ptr.vmem [resolvable:$false] %s2209_s13 }
0x15aa   : > { %s1607_s26 = sshll.u32 %s2615_s12, 4  ;;  %s2211_s0 = scalar_lea.vmem %s2210_s13, 256  ;;  %s1608_s26 = int_to_ptr.vmem [resolvable:$true] %s1607_s26 }
0x15ab   : > { %s2205_s18 = scalar_lea.vmem %s1608_s26, 128  ;;  %p2212_p0 = scmp.lt.s32.totalorder %s1608_s26, %s2210_s13 }
0x15ac   : > { %p2206_p11 = scmp.ne.s32.totalorder %s1608_s26, %s2205_s18  ;;  %p2213_p1 = scmp.lt.s32.totalorder %s2211_s0, %s2205_s18 }
0x15ae   : > { %p2207_p12 = pnand %p2206_p11, %p2392_p5  ;;  %p2214_p2 = por %p2213_p1, %p2212_p0 }
0x15b0   : > { %p2208_p13 = pneg %p2207_p12 }
0x15b2   : > { %p2215_p3 = pnand %p2214_p2, %p2208_p13 }
0x15cd   : > { %1482 = vmax.xlane.f32.xlu1 %v1481_v14 }
0x15d1   : > { %1491 = vmax.xlane.f32.xlu1 %v1490_v18 }
0x15e0   : > { %v1480_v25 = vpop.xlane.xlu0 %1479 }
0x15e1   : > { %v1502_v30 = vsub.f32 %v1440_v4, %v1480_v25 }
0x15e3   : > { %v1510_v33 = vmul.f32 1.442695, %v1502_v30 }
0x15e4   : > { %v1486_v26 = vpop.xlane.xlu0 %1485 }
0x15e5   : > { %v1504_v34 = vsub.f32 %v1450_v16, %v1486_v26 }
0x15e7   : > { %v1514_v39 = vmul.f32 1.442695, %v1504_v34 }
0x15e8   : > { %v1489_v28 = vpop.xlane.xlu0 %1488 }
0x15e9   : > { %v1505_v31 = vsub.f32 %v1455_v10, %v1489_v28 }
0x15eb   : > { %v1516_v37 = vmul.f32 1.442695, %v1505_v31 }
0x15ec   : > { %v1495_v35 = vpop.xlane.xlu0 %1494 }
0x15ed   : > { %v1507_v38 = vsub.f32 %v1465_v6, %v1495_v35 }
0x15ef   : > { %v1520_v41 = vmul.f32 1.442695, %v1507_v38 }
0x161b   : > { %v1327_v20 = vpop.permute.xlu1 %1326 }
0x161c   : > { %1329 = vst.msk [vmem:[#allocation2 + $0x38] sm:$0xff] %vm512_vm2, %v1327_v20  ;;  %1574 = vst.msk [vmem:[%s2615_s12] sm:$0xff] %vm512_vm2, %v1327_v20 }
0x1623   : > { %v1337_v24 = vld [vmem:[#allocation2 + $0x38] sm:$0xff] }
0x1624   : > { %1995 = vmatmul.mubr.msk.f32.gmra.mrb[16].mxu0 %vm512_vm2, %v1337_v24 }
0x165a   : > { %v1483_v27 = vpop.xlane.xlu1 %1482 }
0x165b   : > { %v1503_v29 = vsub.f32 %v1445_v12, %v1483_v27 }
0x165d   : > { %v1512_v32 = vmul.f32 1.442695, %v1503_v29 }
0x165e   : > { %v1492_v36 = vpop.xlane.xlu1 %1491 }
0x165f   : > { %2173 = vpow2.f32 %v1512_v32  ;;  %v1506_v40 = vsub.f32 %v1460_v13, %v1492_v36 }
0x1660   : > { %2175 = vpow2.f32 %v1510_v33 }
0x1661   : > { %2177 = vpow2.f32 %v1516_v37  ;;  %v1518_v42 = vmul.f32 1.442695, %v1506_v40 }
0x1662   : > { %2179 = vpow2.f32 %v1514_v39 }
0x1663   : > { %2181 = vpow2.f32 %v1520_v41 }
0x1664   : > { %2183 = vpow2.f32 %v1518_v42 }
0x1669   : > { %v2174_v47 = vpop.eup %2173 }
0x166a   : > { %v2176_v49 = vpop.eup %2175  ;;  %v1529_v50 = vsel %vm512_vm2, %v2174_v47, 0.0 }
0x166b   : > { %v2178_v51 = vpop.eup %2177  ;;  %v1526_v52 = vsel %vm512_vm2, %v2176_v49, 0.0 }
0x166c   : > { %v2180_v53 = vpop.eup %2179  ;;  %v1535_v54 = vsel %vm512_vm2, %v2178_v51, 0.0 }
0x166d   : > { %v2182_v55 = vpop.eup %2181  ;;  %v1532_v56 = vsel %vm512_vm2, %v2180_v53, 0.0 }
0x166e   : > { %v2184_v57 = vpop.eup %2183  ;;  %v1541_v19 = vsel %vm512_vm2, %v2182_v55, 0.0 }
0x166f   : > { %v1538_v58 = vsel %vm512_vm2, %v2184_v57, 0.0 }
0x16f7   : > { %v1996_v43 = vpop.f32.mrb[16].mxu0 }
0x16f8   : > { %v1475_v44 = vadd.f32 %v1996_v43, %v1793_v8  ;;  %v1469_v45 = vpop.f32.mrb[17].mxu0 }
0x16f9   : > { %v1470_v23 = vadd.f32 %v1793_v8, %v1469_v45 }
0x16fa   : > { %v1499_v46 = vsel %vm512_vm2, %v1475_v44, -inf }
0x16fb   : > { %1500 = vmax.xlane.f32.xlu0 %v1499_v46  ;;  %v1496_v48 = vsel %vm512_vm2, %v1470_v23, -inf }
0x16fc   : > { %1497 = vmax.xlane.f32.xlu1 %v1496_v48 }
0x16ff   : > { %1530 = vadd.xlane.f32.xlu0 %v1529_v50 }
0x1700   : > { %1527 = vadd.xlane.f32.xlu1 %v1526_v52 }
0x1703   : > { %1536 = vadd.xlane.f32.xlu0 %v1535_v54 }
0x1704   : > { %1533 = vadd.xlane.f32.xlu1 %v1532_v56 }
0x1707   : > { %1542 = vadd.xlane.f32.xlu0 %v1541_v19 }
0x1708   : > { %1539 = vadd.xlane.f32.xlu1 %v1538_v58 }
0x1788   : > { %v1501_v59 = vpop.xlane.xlu0 %1500 }
0x1789   : > { %v1509_v60 = vsub.f32 %v1475_v44, %v1501_v59  ;;  %v1498_v61 = vpop.xlane.xlu1 %1497 }
0x178a   : > { %v1508_v62 = vsub.f32 %v1470_v23, %v1498_v61 }
0x178b   : > { %v1524_v63 = vmul.f32 1.442695, %v1509_v60 }
0x178c   : > { %v1522_v0 = vmul.f32 1.442695, %v1508_v62  ;;  %v1531_v1 = vpop.xlane.xlu0 %1530 }
0x178d   : > { %2185 = vpow2.f32 %v1524_v63  ;;  %v1528_v2 = vpop.xlane.xlu1 %1527 }
0x178e   : > { %2187 = vpow2.f32 %v1522_v0 }
0x178f   : > { %2189 = vrcp.f32 %v1531_v1 }
0x1790   : > { %2191 = vrcp.f32 %v1528_v2  ;;  %v1537_v3 = vpop.xlane.xlu0 %1536 }
0x1791   : > { %2193 = vrcp.f32 %v1537_v3  ;;  %v1534_v22 = vpop.xlane.xlu1 %1533 }
0x1792   : > { %2195 = vrcp.f32 %v1534_v22 }
0x1794   : > { %v1543_v8 = vpop.xlane.xlu0 %1542 }
0x1795   : > { %2197 = vrcp.f32 %v1543_v8  ;;  %v1540_v4 = vpop.xlane.xlu1 %1539 }
0x1796   : > { %2199 = vrcp.f32 %v1540_v4 }
0x1797   : > { %v2628_v16 = vpop.eup %2185 }
0x1798   : > { %v2630_v5 = vpop.eup %2187  ;;  %v1547_v10 = vsel %vm512_vm2, %v2628_v16, 0.0 }
0x1799   : > { %v2190_v15 = vpop.eup %2189  ;;  %1548 = vadd.xlane.f32.xlu0 %v1547_v10  ;;  %v1544_v6 = vsel %vm512_vm2, %v2630_v5, 0.0 }
0x179a   : > { %v2192_v17 = vpop.eup %2191  ;;  %v1559_v7 = vmul.f32 %v2190_v15, %v2174_v47  ;;  %1545 = vadd.xlane.f32.xlu1 %v1544_v6 }
0x179b   : > { %v2194_v9 = vpop.eup %2193  ;;  %v1558_v11 = vmul.f32 %v2192_v17, %v2176_v49 }
0x179c   : > { %v2196_v12 = vpop.eup %2195  ;;  %1567 = vst.msk [vmem:[%s2639_s21 + $0x8] sm:$0xff] %vm512_vm2, %v1559_v7  ;;  %v1561_v13 = vmul.f32 %v2194_v9, %v2178_v51 }
0x179d   : > { %1566 = vst.msk [vmem:[%s2639_s21] sm:$0xff] %vm512_vm2, %v1558_v11  ;;  %v1560_v14 = vmul.f32 %v2196_v12, %v2180_v53 }
0x179e   : > { %1569 = vst.msk [vmem:[%s2639_s21 + $0x18] sm:$0xff] %vm512_vm2, %v1561_v13 }
0x179f   : > { %v2198_v18 = vpop.eup %2197  ;;  %1568 = vst.msk [vmem:[%s2639_s21 + $0x10] sm:$0xff] %vm512_vm2, %v1560_v14 }
0x17a0   : > { %v2200_v20 = vpop.eup %2199  ;;  %v1563_v24 = vmul.f32 %v2198_v18, %v2182_v55 }
0x17a1   : > { %v1562_v25 = vmul.f32 %v2200_v20, %v2184_v57 }
0x17a2   : > { %1571 = vst.msk [vmem:[%s2639_s21 + $0x28] sm:$0xff] %vm512_vm2, %v1563_v24 }
0x17a3   : > { %1570 = vst.msk [vmem:[%s2639_s21 + $0x20] sm:$0xff] %vm512_vm2, %v1562_v25 }
0x17ab   : > { %1576 = vrot.lane.b32.xlu1 %v2592_v21, %s2306_s17 }
0x17ac   : > { %2218 = shalt.err (!%p2215_p3)
}
0x17ad   : > { %s2219_s12 = scalar_lea.hbm %s2662_s24, 128  ;;  %s2223_s23 = scalar_lea.hbm %s2747_s7, 384 }
0x17ae   : > { %p2220_p4 = scmp.ne.s32.totalorder %s2662_s24, %s2219_s12  ;;  %p2224_p9 = scmp.lt.u32.totalorder %s2662_s24, %s2747_s7 }
0x17af   : > { %p2225_p10 = scmp.lt.u32.totalorder %s2223_s23, %s2219_s12  ;;  %p2227_p12 = scmp.lt.u32.totalorder %s2219_s12, %s2662_s24 }
0x17b0   : > { %p2221_p7 = pnand %p2220_p4, %p2392_p5 }
0x17b1   : > { %p2226_p11 = por %p2225_p10, %p2224_p9 }
0x17b2   : > { %p2222_p8 = pneg %p2221_p7 }
0x17b3   : > { %p2228_p13 = por %p2227_p12, %p2226_p11 }
0x17b5   : > { %p2229_p0 = pnand %p2228_p13, %p2222_p8 }
0x17b7   : > { %2232 = shalt.err (!%p2229_p0)
}
0x17b8   : > { %2059 = dma.vmem_to_hbm [thread:$0]  (%p2392_p5), %s1608_s26, 128, %s2662_s24, %s1586_s25  }
0x17b9   : > { %s2754_s0 = sshll.u32 %s2609_s10, 3  ;;  %s2690_s23 = scalar_lea.hbm %s2748_s8, %s1804_s19 }
0x17ba   : > { %s342_s18 = scalar_lea.vmem [#allocation5], %s2754_s0  ;;  %s1591_s24 = scalar_lea.sflag [#allocation6], %s2609_s10 }
0x17bb   : > { %s1620_s17 = sshll.u32 %s342_s18, 4  ;;  %s2308_s9 = smov [#allocation5]   ;;  %s2692_s17 = int_to_ptr.vmem [resolvable:$true] %s1620_s17 }
0x17bc   : > { %s2233_s26 = scalar_lea.vmem %s2692_s17, 128  ;;  %s2237_s25 = sshll.u32 %s2308_s9, 4  ;;  %s2238_s25 = int_to_ptr.vmem [resolvable:$false] %s2237_s25 }
0x17bd   : > { %p2234_p1 = scmp.ne.s32.totalorder %s2692_s17, %s2233_s26  ;;  %s2239_s20 = scalar_lea.vmem %s2238_s25, 256 }
0x17be   : > { %p2240_p4 = scmp.lt.s32.totalorder %s2692_s17, %s2238_s25  ;;  %p2241_p7 = scmp.lt.s32.totalorder %s2239_s20, %s2233_s26 }
0x17bf   : > { %p2235_p2 = pnand %p2234_p1, %p2392_p5 }
0x17c0   : > { %p2242_p8 = por %p2241_p7, %p2240_p4 }
0x17c1   : > { %p2236_p3 = pneg %p2235_p2 }
0x17c3   : > { %p2243_p9 = pnand %p2242_p8, %p2236_p3 }
0x1826   : > { %v1549_v21 = vpop.xlane.xlu0 %1548 }
0x1827   : > { %2201 = vrcp.f32 %v1549_v21  ;;  %v1546_v26 = vpop.xlane.xlu1 %1545 }
0x1828   : > { %2203 = vrcp.f32 %v1546_v26 }
0x182b   : > { %v1577_v27 = vpop.permute.xlu1 %1576 }
0x182c   : > { %1579 = vst.msk [vmem:[%s342_s18] sm:$0xff] %vm512_vm2, %v1577_v27 }
0x182d   : > { %2246 = shalt.err (!%p2243_p9)
}
0x182e   : > { %s2247_s10 = scalar_lea.hbm %s2690_s23, 128  ;;  %s2251_s0 = scalar_lea.hbm %s2748_s8, 384 }
0x182f   : > { %p2248_p10 = scmp.ne.s32.totalorder %s2690_s23, %s2247_s10  ;;  %p2252_p13 = scmp.lt.u32.totalorder %s2690_s23, %s2748_s8 }
0x1830   : > { %p2253_p0 = scmp.lt.u32.totalorder %s2251_s0, %s2247_s10  ;;  %p2255_p2 = scmp.lt.u32.totalorder %s2247_s10, %s2690_s23 }
0x1831   : > { %p2249_p11 = pnand %p2248_p10, %p2392_p5 }
0x1832   : > { %p2254_p1 = por %p2253_p0, %p2252_p13 }
0x1833   : > { %p2250_p12 = pneg %p2249_p11 }
0x1834   : > { %p2256_p3 = por %p2255_p2, %p2254_p1 }
0x1836   : > { %p2257_p4 = pnand %p2256_p3, %p2250_p12 }
0x1838   : > { %2260 = shalt.err (!%p2257_p4)
}
0x1839   : > { %2060 = dma.vmem_to_hbm [thread:$0]  (%p2392_p5), %s2692_s17, 128, %s2690_s23, %s1591_s24   ;;  %v2202_v28 = vpop.eup %2201 }
0x183a   : > { %v2204_v29 = vpop.eup %2203  ;;  %v1565_v30 = vmul.f32 %v2202_v28, %v2628_v16 }
0x183b   : > { %v1564_v31 = vmul.f32 %v2204_v29, %v2630_v5 }
0x183c   : > { %1573 = vst.msk [vmem:[%s2639_s21 + $0x38] sm:$0xff] %vm512_vm2, %v1565_v30 }
0x183d   : > { %1572 = vst.msk [vmem:[%s2639_s21 + $0x30] sm:$0xff] %vm512_vm2, %v1564_v31 }
0x183e PF: > { %p2070_p7 = scmp.ge.s32.totalorder %s2299_s30, 2  ;;  %s1640_s15 = sand.u32 1, %s2287_s27  }
0x183f   : > { %s1641_s22 = scalar_lea.sflag [#allocation4], %s1640_s15 }
0x1840   : > { %p2064_p8 = pnand %p2070_p7, %p2396_p6 }
0x1842   : > { %2278 = dma.done.wait (!%p2064_p8), %s1641_s22, 128  }
0x1843   : > { %2280 = vsyncadd (!%p2064_p8), %s1641_s22, 4294967168  ;;  %s1650_s17 = scalar_lea.sflag [#allocation6], %s1640_s15 }
0x1844   : > { %2282 = dma.done.wait (!%p2064_p8), %s1650_s17, 128  }
0x1845   : > { %2284 = vsyncadd (!%p2064_p8), %s1650_s17, 4294967168  ;;  %p22_p5 = scmp.ge.s32.totalorder %s2379_s11, 5   ;;  %s2755_s27 = smov %s2291_s28 }
0x1846   : > { %s2756_s28 = smov %s2295_s29  ;;  %s2757_s29 = smov %s2390_s14 }
0x1847   : > { %s2758_s30 = smov %s2379_s11  ;;  %24 = sbr.rel (!%p22_p5) target bundleno = 7 (0x7), region = 114 }
0x184e   :  { %1655 = vsyncpa [#allocation4], 1 }
0x184f   :  { %1657 = vsyncpa [#allocation4 + $0x1], 1 }
0x1850   :  { %1658 = vsyncpa [#allocation6], 1 }
0x1851   :  { %1660 = vsyncpa [#allocation6 + $0x1], 1 }

</bundles_post_ra>
